<compile_context>
chip_gen: v7x
topology: tpu7x:2x2x1
jax: 0.10.0
libtpu: 0.0.40
codegen_flags: <defaults>
</compile_context>

<pallas_src>
import jax
import jax.numpy as jnp
from jax.experimental import pallas as pl
from jax.experimental.pallas import tpu as pltpu


def _round_up(x, m):
    return ((x + m - 1) // m) * m


# -----------------------------------------------------------------------------
# Pass 1: per-tile partial BN statistics (sum(y), sum(y^2) per output channel).
# -----------------------------------------------------------------------------
def _conv_stats_kernel(xcol_ref, w_ref, stats_ref):
    # (tile_m, K) @ (K, Cpad) on the MXU: bf16 inputs, f32 accumulation.
    y = jnp.dot(xcol_ref[...], w_ref[...], preferred_element_type=jnp.float32)
    s1 = jnp.sum(y, axis=0, keepdims=True)       # (1, Cpad)
    s2 = jnp.sum(y * y, axis=0, keepdims=True)   # (1, Cpad)
    stats_ref[...] = jnp.concatenate([s1, s2], axis=0).reshape(stats_ref.shape)


# -----------------------------------------------------------------------------
# Pass 2: recompute y per tile, apply the BN affine. act_layer is Identity.
# -----------------------------------------------------------------------------
def _conv_bn_apply_kernel(xcol_ref, w_ref, scale_ref, shift_ref, out_ref):
    y = jnp.dot(xcol_ref[...], w_ref[...], preferred_element_type=jnp.float32)
    out_ref[...] = (y * scale_ref[...] + shift_ref[...]).astype(out_ref.dtype)


def _pick_tile_m(m_rows, k_pad, cout_pad):
    """Largest M tile whose double-buffered in/out tiles stay inside a
    conservative VMEM budget (safe for v7x's 64 MiB physical VMEM), while
    keeping >= 2 grid steps when possible so the DMA pipeline is exercised."""
    budget = 12 * 1024 * 1024
    row_bytes = k_pad * 2 + cout_pad * 4          # bf16 x_col row + f32 out row
    m8 = _round_up(max(m_rows, 8), 8)
    if m8 <= 256:
        return m8
    for t in (1024, 512, 256):
        if 2 * row_bytes * t <= budget and m8 > t:
            return t
    return 256


def conv2d_bn(x, weight, gamma, beta, *, stride=1, pad=0, dilation=1,
              groups=1, eps=1e-5):
    """x: (N, Cin, H, W) f32, weight: (Cout, Cin, kh, kw) f32 -> NCHW output."""
    N, C, H, W = x.shape
    Cout, Cin, kh, kw = weight.shape
    assert groups == 1 and Cin == C  # TODO(synk): grouped conv (groups>1) not implemented

    Ho = (H + 2 * pad - dilation * (kh - 1) - 1) // stride + 1
    Wo = (W + 2 * pad - dilation * (kw - 1) - 1) // stride + 1
    M = N * Ho * Wo
    K = C * kh * kw

    # ---- glue: NHWC im2col (XLA). ------------------------------------------
    # TODO(synk): move the patch gather into the kernel (index_map over
    # (ho-tile, kh, kw) reading contiguous NHWC slabs) to remove the kh*kw x
    # HBM blow-up for large shapes.
    x_nhwc = jnp.transpose(x, (0, 2, 3, 1))
    xp = jnp.pad(x_nhwc, ((0, 0), (pad, pad), (pad, pad), (0, 0)))
    cols = []
    for i in range(kh):
        for j in range(kw):
            hs, ws = i * dilation, j * dilation
            cols.append(xp[:, hs:hs + stride * (Ho - 1) + 1:stride,
                             ws:ws + stride * (Wo - 1) + 1:stride, :])
    # (N, Ho, Wo, C, kh*kw): K ordering (c, i, j) matches PyTorch's
    # weight.reshape(Cout, Cin*kh*kw) flattening.
    patches = jnp.stack(cols, axis=-1)
    x_col = patches.reshape(M, K)

    # ---- lane/sublane-dense padded GEMM operands, bf16 MXU feed. -----------
    k_pad = _round_up(K, 8)
    c_pad = _round_up(Cout, 128)
    tile_m = _pick_tile_m(M, k_pad, c_pad)
    m_pad = _round_up(M, tile_m)
    n_tiles = m_pad // tile_m

    # Zero-padded M rows produce y == 0, so they add nothing to sum / sum-of-
    # squares; dividing by the true M below keeps the BN stats exact.
    x_col = jnp.pad(x_col, ((0, m_pad - M), (0, k_pad - K))).astype(jnp.bfloat16)
    w_mat = jnp.pad(weight.reshape(Cout, K).T.astype(jnp.float32),
                    ((0, k_pad - K), (0, c_pad - Cout))).astype(jnp.bfloat16)

    cparams = pltpu.CompilerParams(dimension_semantics=("parallel",),
                                   vmem_limit_bytes=32 * 1024 * 1024)

    # ---- pass 1: per-tile partial sums of y and y^2 per channel. -----------
    stats = pl.pallas_call(
        _conv_stats_kernel,
        grid=(n_tiles,),
        in_specs=[pl.BlockSpec((tile_m, k_pad), lambda i: (i, 0)),
                  pl.BlockSpec((k_pad, c_pad), lambda i: (0, 0))],
        out_specs=pl.BlockSpec((1, 2, c_pad), lambda i: (i, 0, 0)),
        out_shape=jax.ShapeDtypeStruct((n_tiles, 2, c_pad), jnp.float32),
        compiler_params=cparams,
        cost_estimate=pl.CostEstimate(
            flops=2 * m_pad * k_pad * c_pad,
            transcendentals=0,
            bytes_accessed=(x_col.size * 2 + w_mat.size * 2
                            + n_tiles * 2 * c_pad * 4)),
    )(x_col, w_mat)

    # ---- tiny cross-tile reduction + BN affine coefficients (wrapper glue).
    # BatchNorm2d training mode: biased variance over N*Ho*Wo per channel.
    sums = jnp.sum(stats, axis=0)                       # (2, c_pad)
    mean = sums[0] / jnp.float32(M)
    var = jnp.maximum(sums[1] / jnp.float32(M) - mean * mean, 0.0)
    gamma_p = jnp.pad(gamma.astype(jnp.float32), (0, c_pad - Cout))
    beta_p = jnp.pad(beta.astype(jnp.float32), (0, c_pad - Cout))
    scale = (gamma_p * jax.lax.rsqrt(var + eps)).reshape(1, c_pad)
    shift = (beta_p - mean * (gamma_p * jax.lax.rsqrt(var + eps))).reshape(1, c_pad)
    # TODO(synk): BatchNorm2d training mode also updates running_mean/var
    # (unbiased); only the normalized forward output is produced here.

    # ---- pass 2: recompute y per tile, apply y*scale + shift. --------------
    out_pad = pl.pallas_call(
        _conv_bn_apply_kernel,
        grid=(n_tiles,),
        in_specs=[pl.BlockSpec((tile_m, k_pad), lambda i: (i, 0)),
                  pl.BlockSpec((k_pad, c_pad), lambda i: (0, 0)),
                  pl.BlockSpec((1, c_pad), lambda i: (0, 0)),
                  pl.BlockSpec((1, c_pad), lambda i: (0, 0))],
        out_specs=pl.BlockSpec((tile_m, c_pad), lambda i: (i, 0)),
        out_shape=jax.ShapeDtypeStruct((m_pad, c_pad), jnp.float32),
        compiler_params=cparams,
        cost_estimate=pl.CostEstimate(
            flops=2 * m_pad * k_pad * c_pad,
            transcendentals=0,
            bytes_accessed=(x_col.size * 2 + w_mat.size * 2
                            + 2 * c_pad * 4 + m_pad * c_pad * 4)),
    )(x_col, w_mat, scale, shift)

    # ---- unpad + back to NCHW (wrapper glue). -------------------------------
    out = out_pad[:M, :Cout].reshape(N, Ho, Wo, Cout)
    return jnp.transpose(out, (0, 3, 1, 2))


if __name__ == "__main__":
    # Module config: Conv2d_BN(in_ch=4, out_ch=8, kernel_size=3, stride=1, pad=1)
    in_ch, out_ch, ksize, stride, pad = 4, 8, 3, 1, 1
    N, H, W = 2, 16, 16

    key = jax.random.PRNGKey(0)
    kx, kw_ = jax.random.split(key)

    x = jax.random.normal(kx, (N, in_ch, H, W), dtype=jnp.float32)

    # Deterministic init mirroring the PyTorch __init__:
    #   conv.weight ~ N(0, sqrt(2 / fan_out)), fan_out = kh*kw*out_ch, bias=False
    #   bn.weight = bn_weight_init = 1, bn.bias = 0
    fan_out = ksize * ksize * out_ch
    weight = jax.random.normal(kw_, (out_ch, in_ch, ksize, ksize),
                               dtype=jnp.float32) * jnp.sqrt(2.0 / fan_out)
    gamma = jnp.ones((out_ch,), dtype=jnp.float32)
    beta = jnp.zeros((out_ch,), dtype=jnp.float32)

    out = conv2d_bn(x, weight, gamma, beta, stride=stride, pad=pad)
    jax.block_until_ready(out)

    assert out.shape == (N, out_ch, H, W), out.shape
    assert bool(jnp.all(jnp.isfinite(out)))
    print("KERNEL_OK")
</pallas_src>

<mosaic_0001>
module attributes {stable_mosaic.version = 11 : i64} {
  func.func @_conv_stats_kernel(%arg0: i32, %arg1: memref<256x40xbf16, #tpu.memory_space<vmem>>, %arg2: memref<40x128xbf16, #tpu.memory_space<vmem>>, %arg3: memref<1x2x128xf32, #tpu.memory_space<vmem>>) attributes {dimension_semantics = [#tpu.dimension_semantics<parallel>], iteration_bounds = array<i64: 2>, scalar_prefetch = 0 : i64, scratch_operands = 0 : i64, tpu.core_type = #tpu.core_type<tc>, window_params = [{transform_indices = @transform_0, window_bounds = array<i64: 256, 40>}, {pipeline_mode = #tpu.pipeline_mode<synchronous>, transform_indices = @transform_1, window_bounds = array<i64: 40, 128>}, {transform_indices = @transform_2, window_bounds = array<i64: 1, 2, 128>}]} {
    %c0 = arith.constant 0 : index
    %c0_0 = arith.constant 0 : index
    %0 = vector.load %arg1[%c0, %c0_0] : memref<256x40xbf16, #tpu.memory_space<vmem>>, vector<256x40xbf16>
    %c0_1 = arith.constant 0 : index
    %c0_2 = arith.constant 0 : index
    %1 = vector.load %arg2[%c0_1, %c0_2] : memref<40x128xbf16, #tpu.memory_space<vmem>>, vector<40x128xbf16>
    %cst = arith.constant dense<0.000000e+00> : vector<256x128xf32>
    %2 = tpu.matmul %0, %1, %cst {dimension_numbers = #tpu.dot_dimension_numbers<[1], [0], [0], [1], [0, 0, 1, 1], [], []>} : vector<256x40xbf16>, vector<40x128xbf16>, vector<256x128xf32> -> vector<256x128xf32>
    %cst_3 = arith.constant dense<0.000000e+00> : vector<128xf32>
    %3 = vector.multi_reduction <add>, %2, %cst_3 [0] : vector<256x128xf32> to vector<128xf32>
    %4 = vector.shape_cast %3 : vector<128xf32> to vector<1x128xf32>
    %5 = arith.mulf %2, %2 : vector<256x128xf32>
    %cst_4 = arith.constant dense<0.000000e+00> : vector<128xf32>
    %6 = vector.multi_reduction <add>, %5, %cst_4 [0] : vector<256x128xf32> to vector<128xf32>
    %7 = vector.shape_cast %6 : vector<128xf32> to vector<1x128xf32>
    %8 = tpu.concatenate %4, %7 in 0 : vector<1x128xf32>, vector<1x128xf32> -> vector<2x128xf32>
    %9 = vector.shape_cast %8 : vector<2x128xf32> to vector<1x2x128xf32>
    %c0_5 = arith.constant 0 : index
    %c0_6 = arith.constant 0 : index
    %c0_7 = arith.constant 0 : index
    %10 = vector.load %arg3[%c0_5, %c0_6, %c0_7] : memref<1x2x128xf32, #tpu.memory_space<vmem>>, vector<1x2x128xf32>
    tpu.vector_store %arg3[%c0_5, %c0_6, %c0_7], %9 {strides = array<i32>} : memref<1x2x128xf32, #tpu.memory_space<vmem>>, vector<1x2x128xf32>,
    return
  }
  func.func @transform_0(%arg0: i32) -> (i32, i32) {
    %c0_i32 = arith.constant 0 : i32
    %c0_i32_0 = arith.constant 0 : i32
    return %arg0, %c0_i32 : i32, i32
  }
  func.func @transform_1(%arg0: i32) -> (i32, i32) {
    %c0_i32 = arith.constant 0 : i32
    %c0_i32_0 = arith.constant 0 : i32
    %c0_i32_1 = arith.constant 0 : i32
    return %c0_i32, %c0_i32_0 : i32, i32
  }
  func.func @transform_2(%arg0: i32) -> (i32, i32, i32) {
    %c0_i32 = arith.constant 0 : i32
    %c0_i32_0 = arith.constant 0 : i32
    %c0_i32_1 = arith.constant 0 : i32
    return %arg0, %c0_i32, %c0_i32_0 : i32, i32, i32
  }
}

</mosaic_0001>

<bundles_post_ra>
// kernel: tpu_custom_call.1
= control target key start
LH: loop header
LB: loop body
LE: loop exit
PB: predicated region body
PF: predicated region fallthrough
CT: control target
= control target key end

     0   :  { %7 = vsyncpa [#allocation3], 0  ;;  %s1094_s0 = inlined_call_operand.vmem [shape: bf16[512,40], index: 0, kind: input, shape index: {}]   ;;  %s1095_s1 = inlined_call_operand.vmem [shape: bf16[40,128], index: 1, kind: input, shape index: {}]   ;;  %s1096_s2 = inlined_call_operand.hbm [shape: f32[2,2,128], index: 2, kind: output, shape index: {}]  }
   0x1   :  { %9 = vsyncpa [#allocation3 + $0x1], 0  ;;  %s922_s9 = smov 0   ;;  %s924_s10 = smov 0  }
   0x2   :  { %s926_s11 = smov 0   ;;  %s928_s12 = smov 0  }
   0x3 LB: > { %s672_s13 = sadd.s32 4294967295, %s904_s12   ;;  %s673_s14 = sadd.s32 4294967294, %s904_s12   ;;  %s904_s12 = sphi %s928_s12, %s1102_s12   ;;  %s900_s11 = sphi %s926_s11, %s1101_s11   ;;  %s896_s10 = sphi %s924_s10, %s1100_s10   ;;  %s892_s9 = sphi %s922_s9, %s1099_s9  }
   0x4   : > { %s945_s15 = sadd.s32 1, %s904_s12   ;;  %s69_s16 = sadd.s32 1, %s900_s11 }
   0x5   : > { %s66_s17 = ssub.s32 %s904_s12, %s945_s15  ;;  %p79_p0 = scmp.ne.s32.totalorder %s900_s11, %s896_s10 }
   0x6   : > { %p67_p1 = scmp.eq.s32.totalorder %s66_s17, 0  ;;  %p80_p2 = scmp.eq.s32.totalorder %s672_s13, 1 }
   0x7   : > { %p85_p3 = scmp.ne.s32.totalorder %s896_s10, %s892_s9  ;;  %p86_p4 = scmp.eq.s32.totalorder %s673_s14, 1 }
   0x8   : > { %s955_s18 = scalar_select %p67_p1, %s900_s11, %s69_s16  }
   0x9   : > { %p957_p5 = por %p80_p2, %p79_p0  ;;  %p961_p6 = por %p86_p4, %p85_p3 }
   0xa   : > { %p676_p7 = scmp.ge.s32.totalorder %s904_s12, 1  ;;  %p116_p8 = scmp.lt.s32.totalorder %s904_s12, 3 }
   0xc   : > { %p117_p9 = pnand %p676_p7, %p116_p8 }
   0xd   : > { %v823_v0 = vld [vmem:[%s1095_s1] sm:$0xff] (!%p117_p9)   ;;  %v824_v1 = vld [vmem:[%s1095_s1 + $0x8] sm:$0xff] (!%p117_p9)   ;;  %s973_s25 = sshll.u32 (!%p117_p9), %s672_s13, 5  ;;  %v825_v2 = vld [vmem:[%s1095_s1 + $0x10] ss:$0 sps:$4 sm:$0xff] (!%p117_p9)   ;;  %vm326_vm0 = vcmask (!%p117_p9), 1043456  }
   0xe   : > { %120 = sbr.rel (%p117_p9) target bundleno = 333 (0x14d), region = 28  ;;  %738 = vmatprep.subr.bf16.mxu0 (!%p117_p9), %v823_v0  ;;  %p139_p10 = scmp.lt.s32.totalorder (!%p117_p9), %s973_s25, 63  ;;  %776 = vmatprep.subr.bf16.mxu1 (!%p117_p9), %v823_v0  ;;  %vm277_vm1 = vcmask (!%p117_p9), 326656   ;;  %v328_v3 = vsel (!%p117_p9), %vm326_vm0, %v825_v2, 0  ;;  %vm597_vm2 = vcmask (!%p117_p9), 1040384  }
   0xf   : > { %739 = vmatpush3.bf16.msra.mxu0 (!%p117_p9), %v823_v0  ;;  %779 = vmatpush3.bf16.msra.mxu1 (!%p117_p9), %v823_v0  ;;  %s135_s5 = sand.u32 (!%p117_p9), 1, %s896_s10   ;;  %s1052_s16 = scalar_lea.hbm (!%p117_p9), %s1096_s2, %s973_s25 }
  0x10   : > { %740 = vmatprep.subr.bf16.mxu0 (!%p117_p9), %v824_v1  ;;  %777 = vmatprep.subr.bf16.mxu1 (!%p117_p9), %v824_v1  ;;  %s677_s6 = sshll.u32 (!%p117_p9), %s135_s5, 1  ;;  %s601_s17 = scalar_lea.sflag (!%p117_p9), [#allocation3], %s135_s5 }
  0x11   : > { %s137_s7 = scalar_lea.vmem (!%p117_p9), [#allocation2], %s677_s6  ;;  %s906_s22 = smov (!%p117_p9), [#allocation2]  }
  0x12   : > { %s614_s8 = sshll.u32 (!%p117_p9), %s137_s7, 4  ;;  %s846_s23 = sshll.u32 (!%p117_p9), %s906_s22, 4  ;;  %s1054_s8 = int_to_ptr.vmem [resolvable:$true] %s614_s8  ;;  %s847_s23 = int_to_ptr.vmem [resolvable:$false] %s846_s23 }
  0x13   : > { %741 = vmatpush3.bf16.msra.mxu0 (!%p117_p9), %v824_v1  ;;  %780 = vmatpush3.bf16.msra.mxu1 (!%p117_p9), %v824_v1  ;;  %s842_s21 = scalar_lea.vmem (!%p117_p9), %s1054_s8, 32  ;;  %s848_s24 = scalar_lea.vmem (!%p117_p9), %s847_s23, 64 }
  0x14   : > { %782 = vmatprep.subr.msk.bf16.mxu0 (!%p117_p9), %vm326_vm0, %v825_v2  ;;  %783 = vmatprep.subr.msk.bf16.mxu1 (!%p117_p9), %vm326_vm0, %v825_v2  ;;  %p843_p11 = scmp.ne.s32.totalorder (!%p117_p9), %s1054_s8, %s842_s21  ;;  %p849_p0 = scmp.lt.s32.totalorder (!%p117_p9), %s1054_s8, %s847_s23 }
  0x15   : > { %s140_s28 = scalar_select %p139_p10, %s973_s25, 63 }
  0x16   : > { %p844_p12 = pnand %p843_p11, %p957_p5  ;;  %p850_p1 = scmp.lt.s32.totalorder %s848_s24, %s842_s21 }
  0x17   : > { %s679_s29 = sshll.u32 %s140_s28, 2  ;;  %743 = vmatpush3.bf16.msra.mxu0 %v328_v3  ;;  %781 = vmatpush3.bf16.msra.mxu1 %v328_v3 }
  0x18   : > { %s983_s4 = scalar_lea.vmem %s1094_s0, %s679_s29  ;;  %p845_p13 = pneg %p844_p12 }
  0x19   : > { %v826_v4 = vld [vmem:[%s983_s4] sm:$0xff]   ;;  %v827_v5 = vld [vmem:[%s983_s4 + $0x8] sm:$0xff]   ;;  %v828_v6 = vld [vmem:[%s983_s4 + $0x10] sm:$0xff]   ;;  %p851_p2 = por %p850_p1, %p849_p0 }
  0x1a   : > { %744 = vmatprep.mubr.msk.bf16.mxu0 %vm277_vm1, %v826_v4  ;;  %v829_v7 = vld [vmem:[%s983_s4 + $0x18] sm:$0xff]   ;;  %v834_v8 = vld [vmem:[%s983_s4 + $0x40] sm:$0xff]   ;;  %v835_v9 = vld [vmem:[%s983_s4 + $0x48] sm:$0xff]  }
  0x1b   : > { %745 = vmatmul.mubr.msk.bf16.vlgmr.msra.gmra.mrb[0].mxu0 %vm277_vm1, %v827_v5  ;;  %760 = vmatprep.mubr.msk.bf16.mxu1 %vm277_vm1, %v834_v8  ;;  %v836_v10 = vld [vmem:[%s983_s4 + $0x50] sm:$0xff]   ;;  %v830_v11 = vld [vmem:[%s983_s4 + $0x20] sm:$0xff]   ;;  %v837_v12 = vld [vmem:[%s983_s4 + $0x58] sm:$0xff]   ;;  %p852_p3 = pnand %p851_p2, %p845_p13 }
  0x1c   : > { %748 = vmatprep.mubr.msk.bf16.mxu0 %vm277_vm1, %v828_v6  ;;  %761 = vmatmul.mubr.msk.bf16.vlgmr.msra.gmra.mrb[0].mxu1 %vm277_vm1, %v835_v9  ;;  %v838_v13 = vld [vmem:[%s983_s4 + $0x60] sm:$0xff]   ;;  %v831_v14 = vld [vmem:[%s983_s4 + $0x28] sm:$0xff]   ;;  %v832_v15 = vld [vmem:[%s983_s4 + $0x30] sm:$0xff]  }
  0x1d   : > { %764 = vmatprep.mubr.msk.bf16.mxu1 %vm277_vm1, %v836_v10  ;;  %v839_v16 = vld [vmem:[%s983_s4 + $0x68] sm:$0xff]   ;;  %v840_v17 = vld [vmem:[%s983_s4 + $0x70] sm:$0xff]   ;;  %v833_v18 = vld [vmem:[%s983_s4 + $0x38] sm:$0xff]  }
  0x1e   : > { %v841_v19 = vld [vmem:[%s983_s4 + $0x78] sm:$0xff]  }
  0x23   : > { %749 = vmatmul.mubr.msk.bf16.gmra.mrb[4].mxu0 %vm277_vm1, %v829_v7 }
  0x24   : > { %752 = vmatprep.mubr.msk.bf16.mxu0 %vm277_vm1, %v830_v11  ;;  %765 = vmatmul.mubr.msk.bf16.gmra.mrb[4].mxu1 %vm277_vm1, %v837_v12 }
  0x25   : > { %768 = vmatprep.mubr.msk.bf16.mxu1 %vm277_vm1, %v838_v13 }
  0x2b   : > { %753 = vmatmul.mubr.msk.bf16.gmra.mrb[8].mxu0 %vm277_vm1, %v831_v14 }
  0x2c   : > { %756 = vmatprep.mubr.msk.bf16.mxu0 %vm277_vm1, %v832_v15  ;;  %769 = vmatmul.mubr.msk.bf16.gmra.mrb[8].mxu1 %vm277_vm1, %v839_v16 }
  0x2d   : > { %772 = vmatprep.mubr.msk.bf16.mxu1 %vm277_vm1, %v840_v17 }
  0x33   : > { %757 = vmatmul.mubr.msk.bf16.gmra.mrb[12].mxu0 %vm277_vm1, %v833_v18 }
  0x34   : > { %773 = vmatmul.mubr.msk.bf16.gmra.mrb[12].mxu1 %vm277_vm1, %v841_v19 }
  0xee   : > { %v746_v20 = vpop.f32.mrb[0].mxu0 }
  0xef   : > { %v364_v21 = vpop.f32.mrb[1].mxu0  ;;  %v1017_v27 = vpop.f32.mrb[0].mxu1  ;;  %v530_v28 = vmul.f32 %v746_v20, %v746_v20 }
  0xf0   : > { %v747_v22 = vpop.f32.mrb[2].mxu0  ;;  %v528_v24 = vmul.f32 %v364_v21, %v364_v21  ;;  %v1019_v31 = vpop.f32.mrb[1].mxu1 }
  0xf1   : > { %v367_v23 = vpop.f32.mrb[3].mxu0  ;;  %v1021_v32 = vpop.f32.mrb[2].mxu1  ;;  %v531_v33 = vmul.f32 %v747_v22, %v747_v22 }
  0xf2   : > { %v491_v25 = vadd.f32 %v367_v23, %v364_v21  ;;  %v529_v26 = vmul.f32 %v367_v23, %v367_v23  ;;  %v1023_v37 = vpop.f32.mrb[3].mxu1 }
  0xf4   : > { %v492_v29 = vadd.f32 %v746_v20, %v491_v25  ;;  %v560_v30 = vadd.f32 %v529_v26, %v528_v24 }
  0xf6   : > { %v561_v34 = vadd.f32 %v560_v30, %v530_v28  ;;  %v750_v35 = vpop.f32.mrb[4].mxu0  ;;  %v493_v36 = vadd.f32 %v747_v22, %v492_v29 }
  0xf7   : > { %v380_v38 = vpop.f32.mrb[5].mxu0  ;;  %v1025_v47 = vpop.f32.mrb[4].mxu1  ;;  %v534_v48 = vmul.f32 %v750_v35, %v750_v35 }
  0xf8   : > { %v494_v39 = vadd.f32 %v493_v36, %v380_v38  ;;  %v532_v40 = vmul.f32 %v380_v38, %v380_v38  ;;  %v562_v41 = vadd.f32 %v561_v34, %v531_v33  ;;  %v751_v42 = vpop.f32.mrb[6].mxu0  ;;  %v444_v51 = vpop.f32.mrb[5].mxu1 }
  0xf9   : > { %v383_v43 = vpop.f32.mrb[7].mxu0  ;;  %v1027_v52 = vpop.f32.mrb[6].mxu1  ;;  %v535_v53 = vmul.f32 %v751_v42, %v751_v42 }
  0xfa   : > { %v563_v44 = vadd.f32 %v562_v41, %v532_v40  ;;  %v495_v45 = vadd.f32 %v494_v39, %v383_v43  ;;  %v533_v46 = vmul.f32 %v383_v43, %v383_v43  ;;  %v447_v57 = vpop.f32.mrb[7].mxu1  ;;  %v546_v43 = vmul.f32 %v1017_v27, %v1017_v27 }
  0xfc   : > { %v496_v49 = vadd.f32 %v750_v35, %v495_v45  ;;  %v564_v50 = vadd.f32 %v563_v44, %v533_v46  ;;  %v544_v35 = vmul.f32 %v1019_v31, %v1019_v31  ;;  %v547_v46 = vmul.f32 %v1021_v32, %v1021_v32 }
  0xfe   : > { %v565_v54 = vadd.f32 %v564_v50, %v534_v48  ;;  %v754_v55 = vpop.f32.mrb[8].mxu0  ;;  %v497_v56 = vadd.f32 %v751_v42, %v496_v49  ;;  %v545_v42 = vmul.f32 %v1023_v37, %v1023_v37 }
  0xff   : > { %v396_v58 = vpop.f32.mrb[9].mxu0  ;;  %v770_v3 = vpop.f32.mrb[8].mxu1  ;;  %v538_v4 = vmul.f32 %v754_v55, %v754_v55 }
 0x100   : > { %v498_v59 = vadd.f32 %v497_v56, %v396_v58  ;;  %v536_v60 = vmul.f32 %v396_v58, %v396_v58  ;;  %v566_v61 = vadd.f32 %v565_v54, %v535_v53  ;;  %v755_v62 = vpop.f32.mrb[10].mxu0  ;;  %v460_v7 = vpop.f32.mrb[9].mxu1  ;;  %v549_v56 = vmul.f32 %v447_v57, %v447_v57 }
 0x101   : > { %v399_v63 = vpop.f32.mrb[11].mxu0  ;;  %v771_v8 = vpop.f32.mrb[10].mxu1  ;;  %v539_v9 = vmul.f32 %v755_v62, %v755_v62 }
 0x102   : > { %v567_v0 = vadd.f32 %v566_v61, %v536_v60  ;;  %v499_v1 = vadd.f32 %v498_v59, %v399_v63  ;;  %v537_v2 = vmul.f32 %v399_v63, %v399_v63  ;;  %v463_v13 = vpop.f32.mrb[11].mxu1 }
 0x104   : > { %v500_v5 = vadd.f32 %v754_v55, %v499_v1  ;;  %v568_v6 = vadd.f32 %v567_v0, %v537_v2  ;;  %v553_v1 = vmul.f32 %v463_v13, %v463_v13  ;;  %v554_v2 = vmul.f32 %v770_v3, %v770_v3 }
 0x106   : > { %v569_v10 = vadd.f32 %v568_v6, %v538_v4  ;;  %v758_v11 = vpop.f32.mrb[12].mxu0  ;;  %v501_v12 = vadd.f32 %v755_v62, %v500_v5  ;;  %v552_v62 = vmul.f32 %v460_v7, %v460_v7  ;;  %v555_v5 = vmul.f32 %v771_v8, %v771_v8 }
 0x107   : > { %v412_v14 = vpop.f32.mrb[13].mxu0  ;;  %v774_v23 = vpop.f32.mrb[12].mxu1  ;;  %v542_v24 = vmul.f32 %v758_v11, %v758_v11 }
 0x108   : > { %v502_v15 = vadd.f32 %v501_v12, %v412_v14  ;;  %v540_v16 = vmul.f32 %v412_v14, %v412_v14  ;;  %v570_v17 = vadd.f32 %v569_v10, %v539_v9  ;;  %v759_v18 = vpop.f32.mrb[14].mxu0  ;;  %v476_v28 = vpop.f32.mrb[13].mxu1 }
 0x109   : > { %v415_v19 = vpop.f32.mrb[15].mxu0  ;;  %v775_v29 = vpop.f32.mrb[14].mxu1  ;;  %v543_v30 = vmul.f32 %v759_v18, %v759_v18  ;;  %v556_v9 = vmul.f32 %v476_v28, %v476_v28 }
 0x10a   : > { %v571_v20 = vadd.f32 %v570_v17, %v540_v16  ;;  %v503_v21 = vadd.f32 %v502_v15, %v415_v19  ;;  %v541_v22 = vmul.f32 %v415_v19, %v415_v19  ;;  %v479_v36 = vpop.f32.mrb[15].mxu1  ;;  %v559_v17 = vmul.f32 %v775_v29, %v775_v29 }
 0x10b   : > { %v557_v15 = vmul.f32 %v479_v36, %v479_v36 }
 0x10c   : > { %v504_v25 = vadd.f32 %v758_v11, %v503_v21  ;;  %v572_v26 = vadd.f32 %v571_v20, %v541_v22 }
 0x10e   : > { %v573_v33 = vadd.f32 %v572_v26, %v542_v24  ;;  %v505_v34 = vadd.f32 %v759_v18, %v504_v25 }
 0x110   : > { %v506_v38 = vadd.f32 %v505_v34, %v1019_v31  ;;  %v574_v39 = vadd.f32 %v573_v33, %v543_v30  ;;  %v548_v31 = vmul.f32 %v444_v51, %v444_v51 }
 0x112   : > { %v575_v40 = vadd.f32 %v574_v39, %v544_v35  ;;  %v507_v41 = vadd.f32 %v506_v38, %v1023_v37  ;;  %v550_v37 = vmul.f32 %v1025_v47, %v1025_v47 }
 0x114   : > { %v508_v44 = vadd.f32 %v1017_v27, %v507_v41  ;;  %v576_v45 = vadd.f32 %v575_v40, %v545_v42  ;;  %v551_v27 = vmul.f32 %v1027_v52, %v1027_v52 }
 0x116   : > { %v577_v48 = vadd.f32 %v576_v45, %v546_v43  ;;  %v509_v49 = vadd.f32 %v1021_v32, %v508_v44 }
 0x118   : > { %v510_v50 = vadd.f32 %v509_v49, %v444_v51  ;;  %v578_v53 = vadd.f32 %v577_v48, %v547_v46 }
 0x11a   : > { %v579_v54 = vadd.f32 %v578_v53, %v548_v31  ;;  %v511_v55 = vadd.f32 %v510_v50, %v447_v57 }
 0x11c   : > { %v512_v58 = vadd.f32 %v1025_v47, %v511_v55  ;;  %v580_v59 = vadd.f32 %v579_v54, %v549_v56 }
 0x11e   : > { %v581_v60 = vadd.f32 %v580_v59, %v550_v37  ;;  %v513_v61 = vadd.f32 %v1027_v52, %v512_v58  ;;  %v558_v52 = vmul.f32 %v774_v23, %v774_v23 }
 0x120   : > { %v514_v32 = vadd.f32 %v513_v61, %v460_v7  ;;  %v582_v63 = vadd.f32 %v581_v60, %v551_v27 }
 0x122   : > { %v583_v51 = vadd.f32 %v582_v63, %v552_v62  ;;  %v515_v0 = vadd.f32 %v514_v32, %v463_v13 }
 0x124   : > { %v516_v57 = vadd.f32 %v770_v3, %v515_v0  ;;  %v584_v4 = vadd.f32 %v583_v51, %v553_v1 }
 0x126   : > { %v585_v6 = vadd.f32 %v584_v4, %v554_v2  ;;  %v517_v47 = vadd.f32 %v771_v8, %v516_v57 }
 0x128   : > { %v518_v10 = vadd.f32 %v517_v47, %v476_v28  ;;  %v586_v11 = vadd.f32 %v585_v6, %v555_v5 }
 0x12a   : > { %v587_v12 = vadd.f32 %v586_v11, %v556_v9  ;;  %v519_v14 = vadd.f32 %v518_v10, %v479_v36 }
 0x12c   : > { %v520_v16 = vadd.f32 %v774_v23, %v519_v14  ;;  %v588_v7 = vadd.f32 %v587_v12, %v557_v15 }
 0x12e   : > { %v521_v18 = vadd.f32 %v775_v29, %v520_v16  ;;  %v589_v19 = vadd.f32 %v588_v7, %v558_v52 }
 0x130   : > { %v522_v13 = vrot.slane %v521_v18, 4  ;;  %v590_v20 = vadd.f32 %v589_v19, %v559_v17 }
 0x132   : > { %v523_v3 = vadd.f32 %v522_v13, %v521_v18  ;;  %v591_v21 = vrot.slane %v590_v20, 4 }
 0x134   : > { %v524_v22 = vrot.slane %v523_v3, 2  ;;  %v592_v8 = vadd.f32 %v591_v21, %v590_v20 }
 0x136   : > { %v525_v24 = vadd.f32 %v524_v22, %v523_v3  ;;  %v593_v25 = vrot.slane %v592_v8, 2 }
 0x138   : > { %v526_v26 = vrot.slane %v525_v24, 1  ;;  %v594_v28 = vadd.f32 %v593_v25, %v592_v8 }
 0x13a   : > { %v595_v30 = vrot.slane %v594_v28, 1  ;;  %v527_v23 = vadd.f32 %v526_v26, %v525_v24 }
 0x13c   : > { %v596_v29 = vadd.f32 %v595_v30, %v594_v28 }
 0x13e   : > { %v598_v33 = vsel %vm597_vm2, %v527_v23, %v596_v29 }
 0x13f   : > { %599 = vst [vmem:[%s137_s7] sm:$0x3] %v598_v33 }
 0x140   : > { %855 = shalt.err (!%p852_p3)
}
 0x141   : > { %s856_s25 = scalar_lea.hbm %s1052_s16, 32  ;;  %s860_s28 = scalar_lea.hbm %s1096_s2, 64 }
 0x142   : > { %p857_p4 = scmp.ne.s32.totalorder %s1052_s16, %s856_s25  ;;  %p861_p9 = scmp.lt.u32.totalorder %s1052_s16, %s1096_s2 }
 0x143   : > { %p862_p10 = scmp.lt.u32.totalorder %s860_s28, %s856_s25  ;;  %p864_p12 = scmp.lt.u32.totalorder %s856_s25, %s1052_s16 }
 0x144   : > { %p858_p7 = pnand %p857_p4, %p957_p5 }
 0x145   : > { %p863_p11 = por %p862_p10, %p861_p9 }
 0x146   : > { %p859_p8 = pneg %p858_p7 }
 0x147   : > { %p865_p13 = por %p864_p12, %p863_p11 }
 0x149   : > { %p866_p0 = pnand %p865_p13, %p859_p8 }
 0x14b   : > { %869 = shalt.err (!%p866_p0)
}
 0x14c   : > { %784 = dma.vmem_to_hbm [thread:$0]  (%p957_p5), %s1054_s8, 32, %s1052_s16, %s601_s17  }
 0x14d PF: > { %p790_p1 = scmp.ge.s32.totalorder %s904_s12, 2  ;;  %s626_s3 = sand.u32 1, %s892_s9  }
 0x14e   : > { %s627_s4 = scalar_lea.sflag [#allocation3], %s626_s3 }
 0x14f   : > { %p787_p2 = pnand %p790_p1, %p961_p6 }
 0x151   : > { %887 = dma.done.wait (!%p787_p2), %s627_s4, 32  }
 0x152   : > { %889 = vsyncadd (!%p787_p2), %s627_s4, 4294967264  ;;  %p12_p3 = scmp.ge.s32.totalorder %s945_s15, 4   ;;  %s1099_s9 = smov %s896_s10 }
 0x153   : > { %s1100_s10 = smov %s900_s11  ;;  %s1101_s11 = smov %s955_s18 }
 0x154   : > { %s1102_s12 = smov %s945_s15  ;;  %14 = sbr.rel (!%p12_p3) target bundleno = 3 (0x3), region = 63 }
 0x15b   :  { %632 = vsyncpa [#allocation3], 1 }
 0x15c   :  { %634 = vsyncpa [#allocation3 + $0x1], 1 }

</bundles_post_ra>
